<compile_context>
chip_gen: v7x
topology: tpu7x:2x2x1
jax: 0.10.0
libtpu: 0.0.40
codegen_flags: <defaults>
</compile_context>

<pallas_src>
import functools

import jax
import jax.numpy as jnp
from jax import lax
from jax.experimental import pallas as pl
from jax.experimental.pallas import tpu as pltpu


def _instance_norm_kernel(x_ref, y_ref, mean_ref, std_ref, *, eps, n):
    # Block: (1, TC, T) — one batch element, a tile of channels, full T on the
    # lane axis. The reduction is only over T, so channel tiling is
    # embarrassingly parallel (partial last tiles: padded rows compute garbage
    # but their writes are masked, and rows never mix).
    x = x_ref[...].astype(jnp.float32)                       # (1, TC, T)

    # One pass over the block: sum and sum of squares.
    s = jnp.sum(x, axis=-1, keepdims=True)                   # (1, TC, 1)
    ss = jnp.sum(x * x, axis=-1, keepdims=True)              # (1, TC, 1)
    mean = s * (1.0 / n)
    # torch.var default is the unbiased estimator (divide by N-1).
    # (T == 1 -> divide by zero -> NaN, same as torch; documented precondition.)
    var = (ss - n * mean * mean) / (n - 1.0)

    inv_std = lax.rsqrt(var + eps)                           # EUP op
    std = (var + eps) * inv_std                              # == sqrt(var + eps)

    y_ref[...] = ((x - mean) * inv_std).astype(y_ref.dtype)
    mean_ref[...] = mean.astype(mean_ref.dtype)
    std_ref[...] = std.astype(std_ref.dtype)


def _pick_channel_tile(C, T, itemsize, target_block_bytes=2 * 1024 * 1024):
    """Channel tile so one (1, TC, T) input block is ~target_block_bytes.

    TC is rounded down to the sublane packing granule (8 rows for 4-byte
    dtypes, 16 for 2-byte, 32 for 1-byte) unless it covers all of C, keeping
    the block shape compliant with the (8, 128)-or-full-dim rule.
    """
    per_channel = max(1, T * itemsize)
    tc = max(1, target_block_bytes // per_channel)
    if tc >= C:
        return C
    granule = {4: 8, 2: 16, 1: 32}.get(itemsize, 8)
    tc = max(granule, (tc // granule) * granule)
    return min(tc, C)


def instance_norm(x, eps=1e-5):
    """Pallas TPU InstanceNorm forward.

    x: (B, C, T). Returns (x_norm (B,C,T), mean (B,C,1), std (B,C,1)),
    matching the PyTorch module's forward.
    """
    assert x.ndim == 3, "InstanceNorm kernel expects (B, C, T) input"
    B, C, T = x.shape

    itemsize = jnp.dtype(x.dtype).itemsize
    TC = _pick_channel_tile(C, T, itemsize)
    num_c_tiles = pl.cdiv(C, TC)
    # TODO(synk): for extremely long T where even a (1, granule, T) f32 block
    # exceeds the VMEM budget (T >~ 500K f32), add a T grid axis marked
    # "arbitrary" that accumulates sum/sumsq in scratch plus a second
    # normalize pass.

    kernel = functools.partial(_instance_norm_kernel, eps=float(eps), n=float(T))

    out_shapes = (
        jax.ShapeDtypeStruct((B, C, T), x.dtype),   # normalized x
        jax.ShapeDtypeStruct((B, C, 1), x.dtype),   # mean
        jax.ShapeDtypeStruct((B, C, 1), x.dtype),   # std
    )

    grid_spec = pltpu.PrefetchScalarGridSpec(
        num_scalar_prefetch=0,
        grid=(B, num_c_tiles),
        in_specs=[pl.BlockSpec((1, TC, T), lambda b, c: (b, c, 0))],
        out_specs=[
            pl.BlockSpec((1, TC, T), lambda b, c: (b, c, 0)),
            pl.BlockSpec((1, TC, 1), lambda b, c: (b, c, 0)),
            pl.BlockSpec((1, TC, 1), lambda b, c: (b, c, 0)),
        ],
    )

    return pl.pallas_call(
        kernel,
        out_shape=out_shapes,
        grid_spec=grid_spec,
        compiler_params=pltpu.CompilerParams(
            # Both axes are independent -> megacore / 2-TC sharding on v7x
            # even when B is small.
            dimension_semantics=("parallel", "parallel"),
            # Allow blocks bigger than the per-generation scoped default
            # (16/32 MiB); actual per-step footprint is kept well below this
            # by the ~2 MiB block sizing, safe for v7x's 64 MiB physical VMEM.
            vmem_limit_bytes=64 * 1024 * 1024,
        ),
    )(x)


def _reference_instance_norm(x, eps=1e-5):
    # Pure-JAX reference matching the PyTorch module exactly.
    B, C = x.shape[:2]
    xf = x.reshape(B, C, -1).astype(jnp.float32)
    mn = xf.mean(-1)
    var = xf.var(-1, ddof=1)  # torch.var default: unbiased
    sd = jnp.sqrt(var + eps)
    mn = mn.reshape(B, C, 1)
    sd = sd.reshape(B, C, 1)
    y = (xf - mn) / sd
    return y.astype(x.dtype), mn.astype(x.dtype), sd.astype(x.dtype)


if __name__ == "__main__":
    key = jax.random.PRNGKey(0)
    B, C, T = 2, 8, 128
    x = jax.random.normal(key, (B, C, T), dtype=jnp.float32) * 2.0 + 0.5

    y, mean, std = instance_norm(x, eps=1e-5)
    jax.block_until_ready((y, mean, std))

    y_ref, mean_ref, std_ref = _reference_instance_norm(x, eps=1e-5)
    assert jnp.allclose(y, y_ref, atol=1e-5, rtol=1e-5)
    assert jnp.allclose(mean, mean_ref, atol=1e-5, rtol=1e-5)
    assert jnp.allclose(std, std_ref, atol=1e-5, rtol=1e-5)

    print("KERNEL_OK")
</pallas_src>

<mosaic_0001>
module attributes {stable_mosaic.version = 11 : i64} {
  func.func @_instance_norm_kernel(%arg0: i32, %arg1: i32, %arg2: memref<1x8x128xf32, #tpu.memory_space<vmem>>, %arg3: memref<1x8x128xf32, #tpu.memory_space<vmem>>, %arg4: memref<1x8x1xf32, #tpu.memory_space<vmem>>, %arg5: memref<1x8x1xf32, #tpu.memory_space<vmem>>) attributes {dimension_semantics = [#tpu.dimension_semantics<parallel>, #tpu.dimension_semantics<parallel>], iteration_bounds = array<i64: 2, 1>, scalar_prefetch = 0 : i64, scratch_operands = 0 : i64, tpu.core_type = #tpu.core_type<tc>, window_params = [{transform_indices = @transform_0, window_bounds = array<i64: 1, 8, 128>}, {transform_indices = @transform_1, window_bounds = array<i64: 1, 8, 128>}, {transform_indices = @transform_2, window_bounds = array<i64: 1, 8, 1>}, {transform_indices = @transform_3, window_bounds = array<i64: 1, 8, 1>}]} {
    %c0 = arith.constant 0 : index
    %c0_0 = arith.constant 0 : index
    %c0_1 = arith.constant 0 : index
    %0 = vector.load %arg2[%c0, %c0_0, %c0_1] : memref<1x8x128xf32, #tpu.memory_space<vmem>>, vector<1x8x128xf32>
    %cst = arith.constant dense<0.000000e+00> : vector<1x8xf32>
    %1 = vector.multi_reduction <add>, %0, %cst [2] : vector<1x8x128xf32> to vector<1x8xf32>
    %2 = vector.shape_cast %1 : vector<1x8xf32> to vector<1x8x1xf32>
    %3 = arith.mulf %0, %0 : vector<1x8x128xf32>
    %cst_2 = arith.constant dense<0.000000e+00> : vector<1x8xf32>
    %4 = vector.multi_reduction <add>, %3, %cst_2 [2] : vector<1x8x128xf32> to vector<1x8xf32>
    %5 = vector.shape_cast %4 : vector<1x8xf32> to vector<1x8x1xf32>
    %cst_3 = arith.constant 7.812500e-03 : f32
    %6 = vector.broadcast %cst_3 : f32 to vector<1x8x1xf32>
    %7 = arith.mulf %2, %6 : vector<1x8x1xf32>
    %cst_4 = arith.constant 1.280000e+02 : f32
    %8 = vector.broadcast %cst_4 : f32 to vector<1x8x1xf32>
    %9 = arith.mulf %8, %7 : vector<1x8x1xf32>
    %10 = arith.mulf %9, %7 : vector<1x8x1xf32>
    %11 = arith.subf %5, %10 : vector<1x8x1xf32>
    %cst_5 = arith.constant 1.270000e+02 : f32
    %12 = vector.broadcast %cst_5 : f32 to vector<1x8x1xf32>
    %13 = arith.divf %11, %12 : vector<1x8x1xf32>
    %cst_6 = arith.constant 9.99999974E-6 : f32
    %14 = vector.broadcast %cst_6 : f32 to vector<1x8x1xf32>
    %15 = arith.addf %13, %14 : vector<1x8x1xf32>
    %16 = math.rsqrt %15 : vector<1x8x1xf32>
    %cst_7 = arith.constant 9.99999974E-6 : f32
    %17 = vector.broadcast %cst_7 : f32 to vector<1x8x1xf32>
    %18 = arith.addf %13, %17 : vector<1x8x1xf32>
    %19 = arith.mulf %18, %16 : vector<1x8x1xf32>
    %20 = vector.broadcast %7 : vector<1x8x1xf32> to vector<1x8x128xf32>
    %21 = arith.subf %0, %20 : vector<1x8x128xf32>
    %22 = vector.broadcast %16 : vector<1x8x1xf32> to vector<1x8x128xf32>
    %23 = arith.mulf %21, %22 : vector<1x8x128xf32>
    %c0_8 = arith.constant 0 : index
    %c0_9 = arith.constant 0 : index
    %c0_10 = arith.constant 0 : index
    %24 = vector.load %arg3[%c0_8, %c0_9, %c0_10] : memref<1x8x128xf32, #tpu.memory_space<vmem>>, vector<1x8x128xf32>
    tpu.vector_store %arg3[%c0_8, %c0_9, %c0_10], %23 {strides = array<i32>} : memref<1x8x128xf32, #tpu.memory_space<vmem>>, vector<1x8x128xf32>,
    %c0_11 = arith.constant 0 : index
    %c0_12 = arith.constant 0 : index
    %c0_13 = arith.constant 0 : index
    %25 = vector.load %arg4[%c0_11, %c0_12, %c0_13] : memref<1x8x1xf32, #tpu.memory_space<vmem>>, vector<1x8x1xf32>
    tpu.vector_store %arg4[%c0_11, %c0_12, %c0_13], %7 {strides = array<i32>} : memref<1x8x1xf32, #tpu.memory_space<vmem>>, vector<1x8x1xf32>,
    %c0_14 = arith.constant 0 : index
    %c0_15 = arith.constant 0 : index
    %c0_16 = arith.constant 0 : index
    %26 = vector.load %arg5[%c0_14, %c0_15, %c0_16] : memref<1x8x1xf32, #tpu.memory_space<vmem>>, vector<1x8x1xf32>
    tpu.vector_store %arg5[%c0_14, %c0_15, %c0_16], %19 {strides = array<i32>} : memref<1x8x1xf32, #tpu.memory_space<vmem>>, vector<1x8x1xf32>,
    return
  }
  func.func @transform_0(%arg0: i32, %arg1: i32) -> (i32, i32, i32) {
    %c0_i32 = arith.constant 0 : i32
    %c0_i32_0 = arith.constant 0 : i32
    return %arg0, %arg1, %c0_i32 : i32, i32, i32
  }
  func.func @transform_1(%arg0: i32, %arg1: i32) -> (i32, i32, i32) {
    %c0_i32 = arith.constant 0 : i32
    %c0_i32_0 = arith.constant 0 : i32
    return %arg0, %arg1, %c0_i32 : i32, i32, i32
  }
  func.func @transform_2(%arg0: i32, %arg1: i32) -> (i32, i32, i32) {
    %c0_i32 = arith.constant 0 : i32
    %c0_i32_0 = arith.constant 0 : i32
    return %arg0, %arg1, %c0_i32 : i32, i32, i32
  }
  func.func @transform_3(%arg0: i32, %arg1: i32) -> (i32, i32, i32) {
    %c0_i32 = arith.constant 0 : i32
    %c0_i32_0 = arith.constant 0 : i32
    return %arg0, %arg1, %c0_i32 : i32, i32, i32
  }
}

</mosaic_0001>

<bundles_post_ra>
// kernel: tpu_custom_call.1
= control target key start
LH: loop header
LB: loop body
LE: loop exit
PB: predicated region body
PF: predicated region fallthrough
CT: control target
= control target key end

     0   :  { %9 = vsyncpa [#allocation3], 0  ;;  %s987_s0 = inlined_call_operand.hbm [shape: f32[2,8,128], index: 0, kind: input, shape index: {}]   ;;  %s988_s1 = inlined_call_operand.hbm [shape: f32[2,8,128], index: 1, kind: output, shape index: {0}]   ;;  %s989_s2 = inlined_call_operand.hbm [shape: f32[2,8,1], index: 2, kind: output, shape index: {1}]   ;;  %s990_s3 = inlined_call_operand.hbm [shape: f32[2,8,1], index: 3, kind: output, shape index: {2}]  }
   0x1   :  { %11 = vsyncpa [#allocation3 + $0x1], 0 }
   0x2   :  { %12 = vsyncpa [#allocation4], 0 }
   0x3   :  { %14 = vsyncpa [#allocation4 + $0x1], 0 }
   0x4   :  { %15 = vsyncpa [#allocation7], 0 }
   0x5   :  { %17 = vsyncpa [#allocation7 + $0x1], 0  ;;  %s733_s12 = smov 0   ;;  %s735_s13 = smov 0  }
   0x6   :  { %s737_s14 = smov 0   ;;  %s739_s15 = smov 0  }
   0x7   :  { %s741_s16 = smov 0   ;;  %s743_s17 = smov 0  }
   0x8 LB: > { %s764_s18 = sadd.s32 4294967295, %s707_s17   ;;  %s443_s19 = sadd.s32 4294967294, %s707_s17   ;;  %s707_s17 = sphi %s743_s17, %s23_s17   ;;  %s703_s16 = sphi %s741_s16, %s1006_s16   ;;  %s699_s15 = sphi %s739_s15, %s1005_s15   ;;  %s695_s14 = sphi %s737_s14, %s1004_s14   ;;  %s691_s13 = sphi %s735_s13, %s1003_s13   ;;  %s687_s12 = sphi %s733_s12, %s1002_s12  }
   0x9   : > { %s35_s20 = sadd.s32 1, %s703_s16  ;;  %s44_s21 = sadd.s32 1, %s695_s14 }
   0xa   : > { %p37_p0 = scmp.ge.s32.totalorder %s35_s20, 2  ;;  %p51_p1 = scmp.ne.s32.totalorder %s695_s14, %s691_s13 }
   0xb   : > { %p52_p2 = scmp.eq.s32.totalorder %s707_s17, 0  ;;  %p57_p3 = scmp.ne.s32.totalorder %s691_s13, %s687_s12 }
   0xc   : > { %s1008_s20 = smov (%p37_p0, %s35_s20), 0  ;;  %p58_p5 = scmp.eq.s32.totalorder %s764_s18, 0 }
   0xd   : > { %p776_p4 = por %p52_p2, %p51_p1  ;;  %s39_s23 = ssub.s32 %s703_s16, %s1008_s20 }
   0xe   : > { %p83_p6 = scmp.eq.s32.totalorder %s764_s18, 1  ;;  %p42_p7 = scmp.eq.s32.totalorder %s39_s23, 0 }
   0xf   : > { %p784_p8 = por %p58_p5, %p57_p3  ;;  %p89_p10 = scmp.eq.s32.totalorder %s443_s19, 1 }
  0x10   : > { %p788_p9 = por %p83_p6, %p51_p1  ;;  %p483_p13 = scmp.lt.s32.totalorder %s707_s17, 2 }
  0x11   : > { %s795_s26 = scalar_select %p42_p7, %s695_s14, %s44_s21  }
  0x12   : > { %s994_s25 = scalar_select %p788_p9, 1, 0 }
  0x13   : > { %p797_p11 = por %p89_p10, %p57_p3  ;;  %s165_s28 = sand.u32 1, %s695_s14  }
  0x14   : > { %s446_s29 = sshll.u32 %s165_s28, 3  ;;  %s447_s30 = sshll.u32 %s703_s16, 7 }
  0x15   : > { %s995_s27 = scalar_select %p797_p11, 1, 0 }
  0x16   : > { %s808_s6 = scalar_lea.hbm %s987_s0, %s447_s30  ;;  %s169_s7 = scalar_lea.vmem [#allocation2], %s446_s29 }
  0x17   : > { %s177_s8 = sshll.u32 %s169_s7, 4  ;;  %p814_p0 = pnand %p483_p13, %p776_p4  ;;  %s810_s8 = int_to_ptr.vmem [resolvable:$true] %s177_s8 }
  0x18   : > { %s166_s10 = scalar_lea.sflag [#allocation3], %s165_s28  ;;  %s535_s11 = scalar_lea.hbm %s808_s6, 128 }
  0x19   : > { %p536_p3 = scmp.ne.s32.totalorder %s808_s6, %s535_s11  ;;  %p537_p5 = pneg %p814_p0 }
  0x1a   : > { %s540_s22 = scalar_lea.hbm %s987_s0, 256  ;;  %p541_p4 = scmp.lt.u32.totalorder %s808_s6, %s987_s0 }
  0x1b   : > { %p538_p6 = pnand %p537_p5, %p536_p3  ;;  %p542_p10 = scmp.lt.u32.totalorder %s540_s22, %s535_s11 }
  0x1c   : > { %p544_p12 = scmp.lt.u32.totalorder %s535_s11, %s808_s6 }
  0x1d   : > { %p539_p7 = pneg %p538_p6  ;;  %p543_p13 = por %p542_p10, %p541_p4 }
  0x1f   : > { %p545_p1 = por %p544_p12, %p543_p13 }
  0x21   : > { %p546_p2 = pnand %p545_p1, %p539_p7 }
  0x23   : > { %549 = shalt.err (!%p546_p2)
}
  0x24   : > { %s550_s28 = scalar_lea.vmem %s810_s8, 128  ;;  %s709_s4 = smov [#allocation2]  }
  0x25   : > { %p551_p3 = scmp.ne.s32.totalorder %s810_s8, %s550_s28  ;;  %s555_s5 = sshll.u32 %s709_s4, 4  ;;  %s556_s5 = int_to_ptr.vmem [resolvable:$false] %s555_s5 }
  0x26   : > { %s557_s7 = scalar_lea.vmem %s556_s5, 256  ;;  %p558_p9 = scmp.lt.s32.totalorder %s810_s8, %s556_s5 }
  0x27   : > { %p553_p6 = pnand %p551_p3, %p537_p5  ;;  %p559_p4 = scmp.lt.s32.totalorder %s557_s7, %s550_s28 }
  0x29   : > { %p554_p11 = pneg %p553_p6  ;;  %p560_p10 = por %p559_p4, %p558_p9 }
  0x2b   : > { %p561_p12 = pnand %p560_p10, %p554_p11 }
  0x2d   : > { %564 = shalt.err (!%p561_p12)
}
  0x2e   : > { %472 = dma.hbm_to_vmem [thread:$0]  (!%p814_p0), %s808_s6, 128, %s810_s8, %s166_s10  }
  0x2f   : > { %p997_p1 = scmp.lt.s32.totalorder %s707_s17, 3  ;;  %p998_p2 = scmp.ge.s32.totalorder %s707_s17, 1 }
  0x31   : > { %p183_p5 = pnand %p998_p2, %p997_p1 }
  0x32   : > { %s850_s11 = sand.u32 (!%p183_p5), 1, %s691_s13  }
  0x33   : > { %186 = sbr.rel (%p183_p5) target bundleno = 275 (0x113), region = 24  ;;  %s853_s21 = sshll.u32 (!%p183_p5), %s850_s11, 3 }
  0x34   : > { %s189_s23 = scalar_lea.sflag (!%p183_p5), [#allocation3], %s850_s11  ;;  %s192_s9 = scalar_lea.vmem (!%p183_p5), [#allocation2], %s853_s21 }
  0x3a   : > { %674 = dma.done.wait (%p784_p8), %s189_s23, 128  }
  0x3b   : > { %676 = vsyncadd (%p784_p8), %s189_s23, 4294967168  ;;  %v225_v0 = vld [vmem:[%s192_s9] sm:$0xff]  ;;  %s251_s6 = sand.u32 1, %s764_s18   ;;  %s863_s8 = sshll.u32 %s699_s15, 7  ;;  %vm243_vm0 = vcmask 7168  }
  0x3c   : > { %226 = vadd.xlane.f32.xlu0 %v225_v0  ;;  %v228_v1 = vmul.f32 %v225_v0, %v225_v0  ;;  %s217_s10 = scalar_lea.vmem [#allocation6], %s853_s21  ;;  %s870_s30 = scalar_lea.hbm %s989_s2, %s863_s8 }
  0x3d   : > { %s285_s22 = sshll.u32 %s217_s10, 4  ;;  %s875_s15 = scalar_lea.sflag [#allocation7], %s251_s6  ;;  %s872_s22 = int_to_ptr.vmem [resolvable:$true] %s285_s22 }
  0x3e   : > { %s565_s18 = scalar_lea.vmem %s872_s22, 128  ;;  %p999_p9 = scmp.ne.s32.totalorder %s994_s25, 0 }
  0x3f   : > { %p566_p8 = scmp.ne.s32.totalorder %s872_s22, %s565_s18  ;;  %s710_s28 = smov [#allocation6]  }
  0x40   : > { %229 = vadd.xlane.f32.xlu0 %v228_v1  ;;  %s569_s4 = sshll.u32 %s710_s28, 4  ;;  %s570_s4 = int_to_ptr.vmem [resolvable:$false] %s569_s4 }
  0x41   : > { %p567_p11 = pnand %p566_p8, %p999_p9  ;;  %s571_s5 = scalar_lea.vmem %s570_s4, 256 }
  0x42   : > { %p572_p7 = scmp.lt.s32.totalorder %s872_s22, %s570_s4  ;;  %p573_p13 = scmp.lt.s32.totalorder %s571_s5, %s565_s18 }
  0x43   : > { %p568_p0 = pneg %p567_p11 }
  0x44   : > { %p574_p3 = por %p573_p13, %p572_p7 }
  0x46   : > { %p575_p6 = pnand %p574_p3, %p568_p0 }
  0xc9   : > { %v227_v2 = vpop.xlane.xlu0 %226 }
  0xca   : > { %v231_v3 = vmul.f32 0.0078125, %v227_v2 }
  0xcc   : > { %v232_v4 = vmul.f32 128.0, %v231_v3  ;;  %244 = vst.msk [vmem:[%s217_s10] sm:$0xff] %vm243_vm0, %v231_v3 }
  0xcd   : > { %v230_v5 = vpop.xlane.xlu0 %229 }
  0xce   : > { %578 = shalt.err (!%p575_p6)
}
  0xcf   : > { %s579_s7 = scalar_lea.hbm %s870_s30, 128  ;;  %s583_s6 = scalar_lea.hbm %s989_s2, 256 }
  0xd0   : > { %p580_p4 = scmp.ne.s32.totalorder %s870_s30, %s579_s7  ;;  %p584_p1 = scmp.lt.u32.totalorder %s870_s30, %s989_s2 }
  0xd1   : > { %p585_p2 = scmp.lt.u32.totalorder %s583_s6, %s579_s7  ;;  %p587_p8 = scmp.lt.u32.totalorder %s579_s7, %s870_s30 }
  0xd2   : > { %p581_p10 = pnand %p580_p4, %p999_p9 }
  0xd3   : > { %p586_p5 = por %p585_p2, %p584_p1 }
  0xd4   : > { %p582_p12 = pneg %p581_p10 }
  0xd5   : > { %p588_p11 = por %p587_p8, %p586_p5 }
  0xd7   : > { %p589_p0 = pnand %p588_p11, %p582_p12 }
  0xd9   : > { %592 = shalt.err (!%p589_p0)
}
  0xda   : > { %464 = dma.vmem_to_hbm [thread:$0]  (%p999_p9), %s872_s22, 128, %s870_s30, %s875_s15   ;;  %v233_v6 = vmul.f32 %v232_v4, %v231_v3  ;;  %v240_v10 = vsub.f32 %v225_v0, %v231_v3 }
  0xdb   : > { %s210_s24 = scalar_lea.vmem [#allocation5], %s853_s21  ;;  %s224_s28 = scalar_lea.vmem [#allocation8], %s853_s21 }
  0xdc   : > { %v234_v7 = vsub.f32 %v230_v5, %v233_v6  ;;  %s271_s18 = sshll.u32 %s210_s24, 4  ;;  %s299_s4 = sshll.u32 %s224_s28, 4  ;;  %s907_s18 = int_to_ptr.vmem [resolvable:$true] %s271_s18  ;;  %s915_s4 = int_to_ptr.vmem [resolvable:$true] %s299_s4 }
  0xdd   : > { %s905_s22 = scalar_lea.hbm %s988_s1, %s863_s8  ;;  %s913_s9 = scalar_lea.hbm %s990_s3, %s863_s8 }
  0xde   : > { %v236_v8 = vmul.f32 0.007874016, %v234_v7  ;;  %s247_s21 = scalar_lea.sflag [#allocation4], %s850_s11  ;;  %s593_s6 = scalar_lea.vmem %s907_s18, 128 }
  0xdf   : > { %p594_p7 = scmp.ne.s32.totalorder %s907_s18, %s593_s6  ;;  %s711_s10 = smov [#allocation5]  }
  0xe0   : > { %v237_v9 = vadd.f32 1e-05, %v236_v8  ;;  %s597_s29 = sshll.u32 %s711_s10, 4  ;;  %s598_s29 = int_to_ptr.vmem [resolvable:$false] %s597_s29 }
  0xe1   : > { %p595_p13 = pnand %p594_p7, %p999_p9  ;;  %s599_s5 = scalar_lea.vmem %s598_s29, 256 }
  0xe2   : > { %533 = vrsqrt.f32 %v237_v9  ;;  %p600_p6 = scmp.lt.s32.totalorder %s907_s18, %s598_s29  ;;  %p601_p4 = scmp.lt.s32.totalorder %s599_s5, %s593_s6 }
  0xe3   : > { %p596_p3 = pneg %p595_p13 }
  0xe4   : > { %p602_p10 = por %p601_p4, %p600_p6 }
  0xe6   : > { %p603_p12 = pnand %p602_p10, %p596_p3 }
  0xec   : > { %v534_v11 = vpop.eup %533 }
  0xed   : > { %v239_v12 = vmul.f32 %v534_v11, %v237_v9  ;;  %v241_v13 = vmul.f32 %v534_v11, %v240_v10 }
  0xef   : > { %242 = vst [vmem:[%s210_s24] sm:$0xff] %v241_v13  ;;  %245 = vst.msk [vmem:[%s224_s28] sm:$0xff] %vm243_vm0, %v239_v12 }
  0xf0   : > { %606 = shalt.err (!%p603_p12)
}
  0xf1   : > { %s607_s11 = scalar_lea.hbm %s905_s22, 128  ;;  %s611_s28 = scalar_lea.hbm %s988_s1, 256 }
  0xf2   : > { %p608_p1 = scmp.ne.s32.totalorder %s905_s22, %s607_s11  ;;  %p612_p8 = scmp.lt.u32.totalorder %s905_s22, %s988_s1 }
  0xf3   : > { %p613_p11 = scmp.lt.u32.totalorder %s611_s28, %s607_s11  ;;  %p615_p7 = scmp.lt.u32.totalorder %s607_s11, %s905_s22 }
  0xf4   : > { %p609_p2 = pnand %p608_p1, %p999_p9 }
  0xf5   : > { %p614_p0 = por %p613_p11, %p612_p8 }
  0xf6   : > { %p610_p5 = pneg %p609_p2 }
  0xf7   : > { %p616_p13 = por %p615_p7, %p614_p0 }
  0xf9   : > { %p617_p3 = pnand %p616_p13, %p610_p5 }
  0xfb   : > { %620 = shalt.err (!%p617_p3)
}
  0xfc   : > { %463 = dma.vmem_to_hbm [thread:$0]  (%p999_p9), %s907_s18, 128, %s905_s22, %s247_s21  }
  0xfd   : > { %s621_s23 = scalar_lea.vmem %s915_s4, 128  ;;  %s712_s6 = smov [#allocation8]  }
  0xfe   : > { %p622_p6 = scmp.ne.s32.totalorder %s915_s4, %s621_s23  ;;  %s625_s10 = sshll.u32 %s712_s6, 4  ;;  %s626_s10 = int_to_ptr.vmem [resolvable:$false] %s625_s10 }
  0xff   : > { %s627_s29 = scalar_lea.vmem %s626_s10, 256  ;;  %p628_p12 = scmp.lt.s32.totalorder %s915_s4, %s626_s10 }
 0x100   : > { %p623_p4 = pnand %p622_p6, %p999_p9  ;;  %p629_p1 = scmp.lt.s32.totalorder %s627_s29, %s621_s23 }
 0x102   : > { %p624_p10 = pneg %p623_p4  ;;  %p630_p2 = por %p629_p1, %p628_p12 }
 0x104   : > { %p631_p5 = pnand %p630_p2, %p624_p10 }
 0x106   : > { %634 = shalt.err (!%p631_p5)
}
 0x107   : > { %s635_s18 = scalar_lea.hbm %s913_s9, 128  ;;  %s639_s5 = scalar_lea.hbm %s990_s3, 256 }
 0x108   : > { %p636_p8 = scmp.ne.s32.totalorder %s913_s9, %s635_s18  ;;  %p640_p7 = scmp.lt.u32.totalorder %s913_s9, %s990_s3 }
 0x109   : > { %p641_p13 = scmp.lt.u32.totalorder %s639_s5, %s635_s18  ;;  %p643_p6 = scmp.lt.u32.totalorder %s635_s18, %s913_s9 }
 0x10a   : > { %p637_p11 = pnand %p636_p8, %p999_p9 }
 0x10b   : > { %p642_p3 = por %p641_p13, %p640_p7 }
 0x10c   : > { %p638_p0 = pneg %p637_p11 }
 0x10d   : > { %p644_p4 = por %p643_p6, %p642_p3 }
 0x10f   : > { %p645_p10 = pnand %p644_p4, %p638_p0 }
 0x111   : > { %648 = shalt.err (!%p645_p10)
}
 0x112   : > { %465 = dma.vmem_to_hbm [thread:$0]  (%p999_p9), %s915_s4, 128, %s913_s9, %s875_s15  }
 0x113 PF: > { %s311_s24 = sand.u32 1, %s687_s12   ;;  %p1000_p12 = scmp.ne.s32.totalorder %s995_s27, 0 }
 0x114   : > { %p1001_p1 = scmp.ge.s32.totalorder %s707_s17, 2  ;;  %s312_s28 = scalar_lea.sflag [#allocation4], %s311_s24 }
 0x116   : > { %p474_p2 = pnand %p1001_p1, %p1000_p12 }
 0x118   : > { %678 = dma.done.wait (!%p474_p2), %s312_s28, 128  }
 0x119   : > { %680 = vsyncadd (!%p474_p2), %s312_s28, 4294967168  ;;  %s320_s7 = sand.u32 1, %s443_s19  }
 0x11a   : > { %s321_s30 = scalar_lea.sflag [#allocation7], %s320_s7 }
 0x11b   : > { %682 = dma.done.wait (!%p474_p2), %s321_s30, 256  }
 0x11c   : > { %684 = vsyncadd (!%p474_p2), %s321_s30, 4294967040  ;;  %s23_s17 = sadd.s32 1, %s707_s17   ;;  %s1002_s12 = smov %s691_s13 }
 0x11d   : > { %p20_p9 = scmp.ge.s32.totalorder %s23_s17, 4   ;;  %s1003_s13 = smov %s695_s14 }
 0x11e   : > { %s1004_s14 = smov %s795_s26  ;;  %s1005_s15 = smov %s703_s16 }
 0x11f   : > { %s1006_s16 = smov %s1008_s20  ;;  %22 = sbr.rel (!%p20_p9) target bundleno = 8 (0x8), region = 101 }
 0x126   :  { %335 = vsyncpa [#allocation3], 1 }
 0x127   :  { %337 = vsyncpa [#allocation3 + $0x1], 1 }
 0x128   :  { %338 = vsyncpa [#allocation4], 1 }
 0x129   :  { %340 = vsyncpa [#allocation4 + $0x1], 1 }
 0x12a   :  { %341 = vsyncpa [#allocation7], 1 }
 0x12b   :  { %343 = vsyncpa [#allocation7 + $0x1], 1 }

</bundles_post_ra>
